<compile_context>
chip_gen: v7x
topology: tpu7x:2x2x1
jax: 0.10.0
libtpu: 0.0.40
codegen_flags: <defaults>
</compile_context>

<pallas_src>
import jax
import jax.numpy as jnp
from jax.experimental import pallas as pl
from jax.experimental.pallas import tpu as pltpu

BN_EPS = 1e-5

# Small synthetic sizes consistent with the module structure
# (real config: encoder_dim['video']=128, modal_dim=32, example_length=300).
ENCODER_DIM = 32     # tcn_channel[modal][-1] == encoder_dim[modal]  (BN1d features)
MODAL_DIM = 8        # fusion output width per modality
OUTPUT_DIM = 2       # regression targets (e.g. valence/arousal)
BATCH = 2
SEQ_LEN = 8          # example_length


def lfan_head_kernel(x_ref, f_ref, wt_ref, wf_ref, b_ref, o_ref):
    """Fused LFAN head on one batch tile, channel-major / lane-dense layout.

    x_ref  : [bt, C, L]   pre-BN TCN features (BN1d folded into wt/b)
    f_ref  : [bt, L, M]   fusion ("follower") output
    wt_ref : [out, C]     regressor weight (TCN slice) with BN scale folded in
    wf_ref : [out, M]     regressor weight (follower slice)
    b_ref  : [out, 1]     regressor bias with folded BN shift
    o_ref  : [bt, out, L] lane-dense output (L on the lane axis)
    """
    wt = wt_ref[...]
    wf = wf_ref[...]
    b = b_ref[...]
    bt = x_ref.shape[0]
    for i in range(bt):  # small static unroll over the batch tile
        # [out, C] @ [C, L] -> [out, L]   (MXU)
        y = jnp.dot(wt, x_ref[i], preferred_element_type=jnp.float32)
        # [out, M] x [L, M] contracting M -> [out, L]   (MXU, rhs-transposed)
        y = y + jax.lax.dot_general(
            wf, f_ref[i], (((1,), (1,)), ((), ())),
            preferred_element_type=jnp.float32)
        # Bias add + tanh (EUP) in f32; REGRESSION task -> tanh.
        o_ref[i] = jnp.tanh(y + b).astype(o_ref.dtype)


def init_params(key, enc_dim=ENCODER_DIM, modal_dim=MODAL_DIM, out_dim=OUTPUT_DIM):
    ks = jax.random.split(key, 6)
    f32 = jnp.float32
    final_dim = enc_dim + modal_dim
    p = {}
    # self.bn[modal] = BatchNorm1d(tcn_channel[modal][-1])   (eval mode)
    p["bn_gamma"] = (jax.random.normal(ks[0], (enc_dim,)) * 0.1 + 1.0).astype(f32)
    p["bn_beta"]  = (jax.random.normal(ks[1], (enc_dim,)) * 0.1).astype(f32)
    p["bn_mean"]  = (jax.random.normal(ks[2], (enc_dim,)) * 0.1).astype(f32)
    p["bn_var"]   = jax.random.uniform(ks[3], (enc_dim,), minval=0.5, maxval=1.5).astype(f32)
    # self.regressor = nn.Linear(final_dim, output_dim)   (PyTorch [out, in] layout)
    p["reg_w"] = (jax.random.normal(ks[4], (out_dim, final_dim)) * 0.05).astype(f32)
    p["reg_b"] = (jax.random.normal(ks[5], (out_dim,)) * 0.05).astype(f32)
    return p


def _fold_bn_into_regressor(p, C):
    """Fold eval-mode BatchNorm1d into the regressor (exact affine composition)."""
    s = p["bn_gamma"] / jnp.sqrt(p["bn_var"] + BN_EPS)     # [C]
    sh = p["bn_beta"] - p["bn_mean"] * s                   # [C]
    w_tcn = p["reg_w"][:, :C] * s[None, :]                 # [out, C]
    w_fol = p["reg_w"][:, C:]                              # [out, M]
    b_eff = p["reg_b"] + p["reg_w"][:, :C] @ sh            # [out]
    return w_tcn, w_fol, b_eff


def _pick_batch_tile(B, L, target_rows=1024):
    """Largest divisor of B with bt*L <= target_rows, keeping >= 2 grid steps
    (so v7x's two TensorCores both get work when B >= 2)."""
    best = 1
    for bt in range(1, B + 1):
        if B % bt != 0:
            continue
        if bt * L > target_rows:
            continue
        if B > 1 and (B // bt) < 2:
            continue
        best = bt
    return best


def lfan_forward(tcn_out, follower, p, *, batch_tile=None, compute_dtype=jnp.float32):
    """Fused LFAN head.

    tcn_out  : [B, C, L]  per-modality TemporalConvNet output (channel-major,
                          as fed to BatchNorm1d in PyTorch).
    follower : [B, L, M]  MultimodalTransformerEncoder output.
    Returns  : [B, L, output_dim]  tanh(regressor(cat(BN(tcn_out).T, follower))).
    """
    B, C, L = tcn_out.shape
    M = follower.shape[-1]
    out_dim = p["reg_w"].shape[0]

    # ---- Fold eval-mode BatchNorm1d + bias into effective regressor params ----
    w_tcn, w_fol, b_eff = _fold_bn_into_regressor(p, C)
    b_eff = b_eff.reshape(out_dim, 1).astype(jnp.float32)

    # Streamed operands (memory-bound kernel: cast to bf16 for the real-size /
    # v5e path; accumulation, bias add and tanh stay f32 inside the kernel).
    x = tcn_out.astype(compute_dtype)
    f = follower.astype(compute_dtype)
    w_tcn = w_tcn.astype(compute_dtype)
    w_fol = w_fol.astype(compute_dtype)

    bt = batch_tile if batch_tile is not None else _pick_batch_tile(B, L)
    assert B % bt == 0, (B, bt)
    grid = (B // bt,)

    itemsize = jnp.dtype(compute_dtype).itemsize
    cost = pl.CostEstimate(
        flops=2 * B * L * (C + M) * out_dim,
        transcendentals=B * L * out_dim,
        bytes_accessed=(B * (C * L + L * M)) * itemsize
                       + (out_dim * (C + M + 1)) * 4
                       + B * out_dim * L * 4,
    )

    out = pl.pallas_call(
        lfan_head_kernel,
        out_shape=jax.ShapeDtypeStruct((B, out_dim, L), jnp.float32),
        grid_spec=pltpu.PrefetchScalarGridSpec(
            num_scalar_prefetch=0,
            grid=grid,
            in_specs=[
                pl.BlockSpec((bt, C, L), lambda i: (i, 0, 0)),    # streamed TCN feats
                pl.BlockSpec((bt, L, M), lambda i: (i, 0, 0)),    # streamed follower
                pl.BlockSpec((out_dim, C), lambda i: (0, 0)),     # resident folded W (tcn)
                pl.BlockSpec((out_dim, M), lambda i: (0, 0)),     # resident W (follower)
                pl.BlockSpec((out_dim, 1), lambda i: (0, 0)),     # resident folded bias
            ],
            out_specs=pl.BlockSpec((bt, out_dim, L), lambda i: (i, 0, 0)),
        ),
        compiler_params=pltpu.CompilerParams(
            dimension_semantics=("parallel",),   # batch axis shards across TCs on v7x
        ),
        cost_estimate=cost,
    )(x, f, w_tcn, w_fol, b_eff)

    # Tiny final layout fix: [B, out, L] -> [B, L, out]  (matches .view(B, L, -1)).
    return jnp.transpose(out, (0, 2, 1))


def reference_forward(tcn_out, follower, p):
    """Pure-JAX reference mirroring the PyTorch (eval-mode) LFAN tail."""
    B, C, L = tcn_out.shape
    s = p["bn_gamma"] / jnp.sqrt(p["bn_var"] + BN_EPS)
    y = (tcn_out - p["bn_mean"][None, :, None]) * s[None, :, None] \
        + p["bn_beta"][None, :, None]                    # BatchNorm1d (eval)
    y = jnp.transpose(y, (0, 2, 1))                      # .transpose(1, 2)
    x = jnp.concatenate([y, follower], axis=-1)          # torch.cat(..., dim=-1)
    x = x @ p["reg_w"].T + p["reg_b"]                    # self.regressor
    x = x.reshape(B, L, -1)                              # .view(B, L, -1)
    return jnp.tanh(x)                                   # REGRESSION task


if __name__ == "__main__":
    key = jax.random.PRNGKey(0)
    k_param, k_x, k_f = jax.random.split(key, 3)
    params = init_params(k_param)

    # Stand-ins for the (external) TCN and fusion-transformer outputs.
    tcn_out = jax.random.normal(k_x, (BATCH, ENCODER_DIM, SEQ_LEN), dtype=jnp.float32)
    follower = jax.random.normal(k_f, (BATCH, SEQ_LEN, MODAL_DIM), dtype=jnp.float32)

    out = lfan_forward(tcn_out, follower, params)
    out = jax.block_until_ready(out)

    ref = reference_forward(tcn_out, follower, params)
    assert out.shape == (BATCH, SEQ_LEN, OUTPUT_DIM), out.shape
    assert jnp.allclose(out, ref, rtol=1e-4, atol=1e-4), "mismatch vs reference"

    print("KERNEL_OK")
</pallas_src>

<mosaic_0001>
module attributes {stable_mosaic.version = 11 : i64} {
  func.func @lfan_head_kernel(%arg0: i32, %arg1: memref<1x32x8xf32, #tpu.memory_space<vmem>>, %arg2: memref<1x8x8xf32, #tpu.memory_space<vmem>>, %arg3: memref<2x32xf32, #tpu.memory_space<vmem>>, %arg4: memref<2x8xf32, #tpu.memory_space<vmem>>, %arg5: memref<2x1xf32, #tpu.memory_space<vmem>>, %arg6: memref<1x2x8xf32, #tpu.memory_space<vmem>>) attributes {dimension_semantics = [#tpu.dimension_semantics<parallel>], iteration_bounds = array<i64: 2>, scalar_prefetch = 0 : i64, scratch_operands = 0 : i64, tpu.core_type = #tpu.core_type<tc>, window_params = [{transform_indices = @transform_0, window_bounds = array<i64: 1, 32, 8>}, {transform_indices = @transform_1, window_bounds = array<i64: 1, 8, 8>}, {pipeline_mode = #tpu.pipeline_mode<synchronous>, transform_indices = @transform_2, window_bounds = array<i64: 2, 32>}, {pipeline_mode = #tpu.pipeline_mode<synchronous>, transform_indices = @transform_3, window_bounds = array<i64: 2, 8>}, {pipeline_mode = #tpu.pipeline_mode<synchronous>, transform_indices = @transform_4, window_bounds = array<i64: 2, 1>}, {transform_indices = @transform_5, window_bounds = array<i64: 1, 2, 8>}]} {
    %c0 = arith.constant 0 : index
    %c0_0 = arith.constant 0 : index
    %0 = vector.load %arg3[%c0, %c0_0] : memref<2x32xf32, #tpu.memory_space<vmem>>, vector<2x32xf32>
    %c0_1 = arith.constant 0 : index
    %c0_2 = arith.constant 0 : index
    %1 = vector.load %arg4[%c0_1, %c0_2] : memref<2x8xf32, #tpu.memory_space<vmem>>, vector<2x8xf32>
    %c0_3 = arith.constant 0 : index
    %c0_4 = arith.constant 0 : index
    %2 = vector.load %arg5[%c0_3, %c0_4] : memref<2x1xf32, #tpu.memory_space<vmem>>, vector<2x1xf32>
    %c0_5 = arith.constant 0 : index
    %c0_6 = arith.constant 0 : index
    %c0_7 = arith.constant 0 : index
    %3 = vector.load %arg1[%c0_5, %c0_6, %c0_7] : memref<1x32x8xf32, #tpu.memory_space<vmem>>, vector<1x32x8xf32>
    %4 = vector.shape_cast %3 : vector<1x32x8xf32> to vector<32x8xf32>
    %cst = arith.constant dense<0.000000e+00> : vector<2x8xf32>
    %5 = tpu.matmul %0, %4, %cst {dimension_numbers = #tpu.dot_dimension_numbers<[1], [0], [0], [1], [0, 0, 1, 1], [], []>} : vector<2x32xf32>, vector<32x8xf32>, vector<2x8xf32> -> vector<2x8xf32>
    %c0_8 = arith.constant 0 : index
    %c0_9 = arith.constant 0 : index
    %c0_10 = arith.constant 0 : index
    %6 = vector.load %arg2[%c0_8, %c0_9, %c0_10] : memref<1x8x8xf32, #tpu.memory_space<vmem>>, vector<1x8x8xf32>
    %7 = vector.shape_cast %6 : vector<1x8x8xf32> to vector<8x8xf32>
    %cst_11 = arith.constant dense<0.000000e+00> : vector<2x8xf32>
    %8 = tpu.matmul %1, %7, %cst_11 {dimension_numbers = #tpu.dot_dimension_numbers<[1], [1], [0], [0], [0, 0, 1, 0], [], []>} : vector<2x8xf32>, vector<8x8xf32>, vector<2x8xf32> -> vector<2x8xf32>
    %9 = arith.addf %5, %8 : vector<2x8xf32>
    %10 = vector.broadcast %2 : vector<2x1xf32> to vector<2x8xf32>
    %11 = arith.addf %9, %10 : vector<2x8xf32>
    %12 = math.tanh %11 : vector<2x8xf32>
    %c0_12 = arith.constant 0 : index
    %c0_13 = arith.constant 0 : index
    %c0_14 = arith.constant 0 : index
    %13 = vector.load %arg6[%c0_12, %c0_13, %c0_14] : memref<1x2x8xf32, #tpu.memory_space<vmem>>, vector<1x2x8xf32>
    %14 = vector.shape_cast %13 : vector<1x2x8xf32> to vector<2x8xf32>
    %15 = vector.shape_cast %12 : vector<2x8xf32> to vector<1x2x8xf32>
    tpu.vector_store %arg6[%c0_12, %c0_13, %c0_14], %15 {strides = array<i32>} : memref<1x2x8xf32, #tpu.memory_space<vmem>>, vector<1x2x8xf32>,
    return
  }
  func.func @transform_0(%arg0: i32) -> (i32, i32, i32) {
    %c0_i32 = arith.constant 0 : i32
    %c0_i32_0 = arith.constant 0 : i32
    %c0_i32_1 = arith.constant 0 : i32
    return %arg0, %c0_i32, %c0_i32_0 : i32, i32, i32
  }
  func.func @transform_1(%arg0: i32) -> (i32, i32, i32) {
    %c0_i32 = arith.constant 0 : i32
    %c0_i32_0 = arith.constant 0 : i32
    %c0_i32_1 = arith.constant 0 : i32
    return %arg0, %c0_i32, %c0_i32_0 : i32, i32, i32
  }
  func.func @transform_2(%arg0: i32) -> (i32, i32) {
    %c0_i32 = arith.constant 0 : i32
    %c0_i32_0 = arith.constant 0 : i32
    %c0_i32_1 = arith.constant 0 : i32
    return %c0_i32, %c0_i32_0 : i32, i32
  }
  func.func @transform_3(%arg0: i32) -> (i32, i32) {
    %c0_i32 = arith.constant 0 : i32
    %c0_i32_0 = arith.constant 0 : i32
    %c0_i32_1 = arith.constant 0 : i32
    return %c0_i32, %c0_i32_0 : i32, i32
  }
  func.func @transform_4(%arg0: i32) -> (i32, i32) {
    %c0_i32 = arith.constant 0 : i32
    %c0_i32_0 = arith.constant 0 : i32
    %c0_i32_1 = arith.constant 0 : i32
    return %c0_i32, %c0_i32_0 : i32, i32
  }
  func.func @transform_5(%arg0: i32) -> (i32, i32, i32) {
    %c0_i32 = arith.constant 0 : i32
    %c0_i32_0 = arith.constant 0 : i32
    %c0_i32_1 = arith.constant 0 : i32
    return %arg0, %c0_i32, %c0_i32_0 : i32, i32, i32
  }
}

</mosaic_0001>

<bundles_post_ra>
// kernel: tpu_custom_call.1
= control target key start
LH: loop header
LB: loop body
LE: loop exit
PB: predicated region body
PF: predicated region fallthrough
CT: control target
= control target key end

     0   :  { %10 = vsyncpa [#allocation3], 0  ;;  %s795_s0 = inlined_call_operand.vmem [shape: f32[2,32,8], index: 0, kind: input, shape index: {}]   ;;  %s796_s1 = inlined_call_operand.vmem [shape: f32[2,8,8], index: 1, kind: input, shape index: {}]   ;;  %s797_s2 = inlined_call_operand.vmem [shape: f32[2,32], index: 2, kind: input, shape index: {}]   ;;  %s798_s3 = inlined_call_operand.vmem [shape: f32[2,8], index: 3, kind: input, shape index: {}]   ;;  %s799_s4 = inlined_call_operand.vmem [shape: f32[2,1], index: 4, kind: input, shape index: {}]   ;;  %s800_s5 = inlined_call_operand.hbm [shape: f32[2,2,8], index: 5, kind: output, shape index: {}]  }
   0x1   :  { %12 = vsyncpa [#allocation3 + $0x1], 0  ;;  %s683_s18 = smov 0   ;;  %s685_s19 = smov 0  }
   0x2   :  { %s687_s20 = smov 0   ;;  %s689_s21 = smov 0  }
   0x3 LB: > { %s704_s22 = sadd.s32 4294967295, %s646_s21   ;;  %s493_s23 = sadd.s32 4294967294, %s646_s21   ;;  %s646_s21 = sphi %s689_s21, %s806_s21   ;;  %s642_s20 = sphi %s687_s20, %s805_s20   ;;  %s638_s19 = sphi %s685_s19, %s804_s19   ;;  %s634_s18 = sphi %s683_s18, %s803_s18  }
   0x4   : > { %s708_s24 = sadd.s32 1, %s646_s21   ;;  %s140_s25 = sadd.s32 1, %s642_s20 }
   0x5   : > { %s137_s26 = ssub.s32 %s646_s21, %s708_s24  ;;  %p150_p0 = scmp.ne.s32.totalorder %s642_s20, %s638_s19 }
   0x6   : > { %p138_p1 = scmp.eq.s32.totalorder %s137_s26, 0  ;;  %p151_p2 = scmp.eq.s32.totalorder %s704_s22, 1 }
   0x7   : > { %p156_p3 = scmp.ne.s32.totalorder %s638_s19, %s634_s18  ;;  %p157_p4 = scmp.eq.s32.totalorder %s493_s23, 1 }
   0x8   : > { %s719_s27 = scalar_select %p138_p1, %s642_s20, %s140_s25  }
   0x9   : > { %p721_p5 = por %p151_p2, %p150_p0  ;;  %p725_p6 = por %p157_p4, %p156_p3 }
   0xa   : > { %p496_p7 = scmp.ge.s32.totalorder %s646_s21, 1  ;;  %p199_p8 = scmp.lt.s32.totalorder %s646_s21, 3 }
   0xc   : > { %p200_p9 = pnand %p496_p7, %p199_p8 }
   0xd   : > { %p231_p10 = scmp.lt.s32.totalorder (!%p200_p9), %s704_s22, 1  ;;  %v648_v0 = vmov (!%p200_p9), 0.0|0.0   ;;  %v649_v1 = vmov (!%p200_p9), 0.0   ;;  %vm650_vm0 = vmmov (!%p200_p9), 0   ;;  %v242_v2 = vld [vmem:[%s799_s4] sm:$0x3] (!%p200_p9) }
   0xe   : > { %203 = sbr.rel (%p200_p9) target bundleno = 276 (0x114), region = 40  ;;  %532 = vmatprep.subr.bf16.mxu1 (!%p200_p9), %v648_v0  ;;  %516 = vmatprep.subr.mxu0 (!%p200_p9), %v649_v1  ;;  %v651_v3 = vmov (!%p200_p9), 0   ;;  %vm248_vm1 = vcmask (!%p200_p9), 64512   ;;  %v241_v10 = vld [vmem:[%s798_s3] sm:$0x3] (!%p200_p9)  ;;  %vm325_vm2 = vcmask (!%p200_p9), 261120  }
   0xf   : > { %518 = vmatprep.mubr.msk.f32.mxu0 (!%p200_p9), %vm650_vm0, %v649_v1  ;;  %529 = vmatprep.mubr.msk.f32.mxu1 (!%p200_p9), %vm650_vm0, %v649_v1  ;;  %v240_v12 = vld [vmem:[%s797_s2] sm:$0x3] (!%p200_p9)  ;;  %s228_s26 = sand.u32 (!%p200_p9), 1, %s638_s19   ;;  %s505_s6 = sshll.u32 (!%p200_p9), %s704_s22, 5  ;;  %vm406_vm3 = vcmask (!%p200_p9), 58368  }
  0x10   : > { %581 = vset.pattern.permute.xlu0 (!%p200_p9), %v651_v3  ;;  %s753_s11 = scalar_lea.hbm (!%p200_p9), %s800_s5, %s505_s6 }
  0x11   : > { %401 = vperm.xlu0 (!%p200_p9), %581, %v242_v2  }
  0x15   : > { %s232_s30 = scalar_select %p231_p10, %s704_s22, 1 }
  0x16   : > { %s652_s22 = smov [#allocation2]  }
  0x17   : > { %s508_s8 = sshll.u32 %s232_s30, 5  ;;  %s500_s9 = sshll.u32 %s232_s30, 3 }
  0x18   : > { %s235_s12 = scalar_lea.vmem %s795_s0, %s508_s8  ;;  %s239_s15 = scalar_lea.vmem %s796_s1, %s500_s9 }
  0x19   : > { %v243_v4 = vld [vmem:[%s235_s12] sm:$0xff]  ;;  %v244_v5 = vld [vmem:[%s235_s12 + $0x8] sm:$0xff]  ;;  %v245_v8 = vld [vmem:[%s235_s12 + $0x10] sm:$0xff]  ;;  %s497_s30 = sshll.u32 %s228_s26, 1  ;;  %s588_s14 = sshll.u32 %s652_s22, 4  ;;  %s589_s14 = int_to_ptr.vmem [resolvable:$false] %s588_s14 }
  0x1a   : > { %v247_v6 = vld [vmem:[%s239_s15] sm:$0xff]  ;;  %v533_v7 = vpack.c.bf16 %v244_v5, %v243_v4  ;;  %v246_v9 = vld [vmem:[%s235_s12 + $0x18] sm:$0xff]  ;;  %s230_s7 = scalar_lea.vmem [#allocation2], %s497_s30  ;;  %s409_s12 = scalar_lea.sflag [#allocation3], %s228_s26 }
  0x1b   : > { %517 = vmatpush3.xpose.msk.msra.mxu0 %vm248_vm1, %v247_v6  ;;  %v536_v11 = vpack.c.bf16 %v246_v9, %v245_v8  ;;  %s422_s8 = sshll.u32 %s230_s7, 4  ;;  %s590_s15 = scalar_lea.vmem %s589_s14, 64  ;;  %s755_s8 = int_to_ptr.vmem [resolvable:$true] %s422_s8 }
  0x1c   : > { %534 = vmatpush3.bf16.msra.mxu1 %v533_v7  ;;  %s584_s13 = scalar_lea.vmem %s755_s8, 32  ;;  %p591_p0 = scmp.lt.s32.totalorder %s755_s8, %s589_s14 }
  0x1d   : > { %535 = vmatprep.subr.bf16.mxu1 %v648_v0  ;;  %p585_p11 = scmp.ne.s32.totalorder %s755_s8, %s584_s13  ;;  %p592_p1 = scmp.lt.s32.totalorder %s590_s15, %s584_s13 }
  0x1e   : > { %519 = vmatmul.mubr.msk.f32.vlgmr.msra.gmra.mrb[0].mxu0 %vm248_vm1, %v241_v10 }
  0x1f   : > { %p586_p12 = pnand %p585_p11, %p721_p5  ;;  %p593_p2 = por %p592_p1, %p591_p0 }
  0x20   : > { %537 = vmatpush3.bf16.msra.mxu1 %v536_v11 }
  0x21   : > { %p587_p13 = pneg %p586_p12 }
  0x23   : > { %530 = vmatmul.mubr.msk.f32.vlgmr.msra.gmra.mrb[0].mxu1 %vm325_vm2, %v240_v12  ;;  %p594_p3 = pnand %p593_p2, %p587_p13 }
  0x90   : > { %v402_v16 = vpop.permute.xlu0 %401 }
  0xf1   : > { %v321_v13 = vpop.f32.mrb[0].mxu0 }
  0xf2   : > { %v520_v14 = vpop.f32.mrb[1].mxu0 }
  0xf6   : > { %v395_v15 = vpop.f32.mrb[0].mxu1 }
  0xf7   : > { %v396_v17 = vadd.f32 %v395_v15, %v321_v13  ;;  %v531_v18 = vpop.f32.mrb[1].mxu1 }
  0xf9   : > { %v404_v19 = vadd.f32 %v402_v16, %v396_v17 }
  0xfb   : > { %582 = vtanh.f32 %v404_v19 }
 0x105   : > { %v583_v20 = vpop.eup %582 }
 0x106   : > { %407 = vst.msk [vmem:[%s230_s7] sm:$0x3] %vm406_vm3, %v583_v20 }
 0x107   : > { %597 = shalt.err (!%p594_p3)
}
 0x108   : > { %s598_s16 = scalar_lea.hbm %s753_s11, 32  ;;  %s602_s25 = scalar_lea.hbm %s800_s5, 64 }
 0x109   : > { %p599_p4 = scmp.ne.s32.totalorder %s753_s11, %s598_s16  ;;  %p603_p9 = scmp.lt.u32.totalorder %s753_s11, %s800_s5 }
 0x10a   : > { %p604_p10 = scmp.lt.u32.totalorder %s602_s25, %s598_s16  ;;  %p606_p12 = scmp.lt.u32.totalorder %s598_s16, %s753_s11 }
 0x10b   : > { %p600_p7 = pnand %p599_p4, %p721_p5 }
 0x10c   : > { %p605_p11 = por %p604_p10, %p603_p9 }
 0x10d   : > { %p601_p8 = pneg %p600_p7 }
 0x10e   : > { %p607_p13 = por %p606_p12, %p605_p11 }
 0x110   : > { %p608_p0 = pnand %p607_p13, %p601_p8 }
 0x112   : > { %611 = shalt.err (!%p608_p0)
}
 0x113   : > { %538 = dma.vmem_to_hbm [thread:$0]  (%p721_p5), %s755_s8, 32, %s753_s11, %s409_s12  }
 0x114 PF: > { %p544_p1 = scmp.ge.s32.totalorder %s646_s21, 2  ;;  %s434_s6 = sand.u32 1, %s634_s18  }
 0x115   : > { %s435_s7 = scalar_lea.sflag [#allocation3], %s434_s6 }
 0x116   : > { %p541_p2 = pnand %p544_p1, %p725_p6 }
 0x118   : > { %629 = dma.done.wait (!%p541_p2), %s435_s7, 32  }
 0x119   : > { %631 = vsyncadd (!%p541_p2), %s435_s7, 4294967264  ;;  %p15_p3 = scmp.ge.s32.totalorder %s708_s24, 4   ;;  %s803_s18 = smov %s638_s19 }
 0x11a   : > { %s804_s19 = smov %s642_s20  ;;  %s805_s20 = smov %s719_s27 }
 0x11b   : > { %s806_s21 = smov %s708_s24  ;;  %17 = sbr.rel (!%p15_p3) target bundleno = 3 (0x3), region = 78 }
 0x122   :  { %440 = vsyncpa [#allocation3], 1 }
 0x123   :  { %442 = vsyncpa [#allocation3 + $0x1], 1 }

</bundles_post_ra>
